<compile_context>
chip_gen: v5e
topology: v5e:2x2
jax: 0.10.0
libtpu: 0.0.40
codegen_flags: <defaults>
</compile_context>

<pallas_src>
import functools
import math

import jax
import jax.numpy as jnp
from jax import lax
from jax.experimental import pallas as pl
from jax.experimental.pallas import tpu as pltpu

LANE = 128
SUBLANE = 8


def _round_up(n, m):
    return ((n + m - 1) // m) * m


def _fused_mlp_kernel(x_ref, w_in_ref, b_in_ref, w_hid_ref, b_hid_ref,
                      w_out_ref, b_out_ref, o_ref, *, num_stacked):
    # Input layer: Linear + ReLU (bf16 operands, f32 accumulation).
    x = x_ref[...].astype(jnp.bfloat16)
    h = jnp.dot(x, w_in_ref[...], preferred_element_type=jnp.float32)
    h = jnp.maximum(h + b_in_ref[...], 0.0)

    # (num_hidden_layers - 1) stacked hidden layers: Linear + ReLU.
    if num_stacked > 0:
        if num_stacked <= 4:
            # Shallow: static unroll is fine and gives the scheduler full visibility.
            for l in range(num_stacked):
                h = jnp.dot(h.astype(jnp.bfloat16), w_hid_ref[l],
                            preferred_element_type=jnp.float32)
                h = jnp.maximum(h + b_hid_ref[l], 0.0)
        else:
            # Deep: fori_loop bounds vreg live ranges; unroll=True keeps LLO visibility.
            def body(l, hc):
                hn = jnp.dot(hc.astype(jnp.bfloat16), w_hid_ref[l],
                             preferred_element_type=jnp.float32)
                return jnp.maximum(hn + b_hid_ref[l], 0.0)
            h = lax.fori_loop(0, num_stacked, body, h, unroll=True)

    # Output layer: Linear + exact sigmoid via tanh (single EUP push, no overflow).
    y = jnp.dot(h.astype(jnp.bfloat16), w_out_ref[...],
                preferred_element_type=jnp.float32)
    y = y + b_out_ref[...]
    o_ref[...] = (0.5 * (jnp.tanh(0.5 * y) + 1.0)).astype(o_ref.dtype)


def init_params(key, num_features, num_classes, num_hidden_layers, hidden_neurons):
    """PyTorch nn.Linear-style (uniform +/- 1/sqrt(fan_in)) init; weights stored (in, out)."""
    dims = [num_features] + [hidden_neurons] * num_hidden_layers + [num_classes]
    params = []
    for fan_in, fan_out in zip(dims[:-1], dims[1:]):
        key, kw, kb = jax.random.split(key, 3)
        bound = 1.0 / math.sqrt(fan_in)
        w = jax.random.uniform(kw, (fan_in, fan_out), jnp.float32, -bound, bound)
        b = jax.random.uniform(kb, (fan_out,), jnp.float32, -bound, bound)
        params.append((w, b))
    return params


def pack_params(params):
    """Stack hidden layers, zero-pad feature dims to lane width, store weights in bf16."""
    w_in, b_in = params[0]
    hidden_pairs = params[1:-1]
    w_out, b_out = params[-1]

    f_in, h = w_in.shape
    _, c = w_out.shape
    hp = _round_up(h, LANE)
    cp = _round_up(c, LANE)
    n_stack = len(hidden_pairs)

    w_in_p = jnp.zeros((f_in, hp), jnp.float32).at[:, :h].set(w_in).astype(jnp.bfloat16)
    b_in_p = jnp.zeros((1, hp), jnp.float32).at[0, :h].set(b_in)

    if n_stack > 0:
        w_hid = jnp.stack([w for w, _ in hidden_pairs])      # (L-1, H, H)
        b_hid = jnp.stack([b for _, b in hidden_pairs])      # (L-1, H)
        w_hid_p = (jnp.zeros((n_stack, hp, hp), jnp.float32)
                   .at[:, :h, :h].set(w_hid).astype(jnp.bfloat16))
        b_hid_p = jnp.zeros((n_stack, 1, hp), jnp.float32).at[:, 0, :h].set(b_hid)
    else:
        # Minimal dummy slab (never read when num_stacked == 0); avoids wasting DMA/VMEM.
        w_hid_p = jnp.zeros((1, SUBLANE, LANE), jnp.bfloat16)
        b_hid_p = jnp.zeros((1, 1, LANE), jnp.float32)

    w_out_p = jnp.zeros((hp, cp), jnp.float32).at[:h, :c].set(w_out).astype(jnp.bfloat16)
    b_out_p = jnp.zeros((1, cp), jnp.float32).at[0, :c].set(b_out)

    return {
        "w_in": w_in_p, "b_in": b_in_p,
        "w_hid": w_hid_p, "b_hid": b_hid_p,
        "w_out": w_out_p, "b_out": b_out_p,
        "num_stacked": n_stack,          # static Python int
        "num_classes": c,                # static Python int
    }


def fixed_neurons_network_forward(x, packed):
    """One fused pallas_call for the whole MLP, tiled over the batch dimension."""
    b, f = x.shape
    hp = packed["w_in"].shape[1]
    cp = packed["w_out"].shape[1]
    n_slab = packed["w_hid"].shape[0]
    hid_sub, hid_lane = packed["w_hid"].shape[1], packed["w_hid"].shape[2]

    # Batch tile: 256 rows feeds the 2x256x256 MXU (v6e/v7x); small batches get one tile.
    if b >= 256:
        tm = 256
    elif b >= 128:
        tm = 128
    else:
        tm = _round_up(max(b, SUBLANE), SUBLANE)
    b_pad = _round_up(b, tm)
    if b_pad != b:
        x = jnp.zeros((b_pad, f), x.dtype).at[:b].set(x)
    grid = (b_pad // tm,)

    # Raise the scoped-VMEM limit if the resident weight slab needs it (headroom included).
    weight_bytes = sum(int(a.size) * a.dtype.itemsize
                       for a in (packed["w_in"], packed["b_in"], packed["w_hid"],
                                 packed["b_hid"], packed["w_out"], packed["b_out"]))
    act_bytes = 2 * tm * (f + cp) * 4 + tm * hp * 4      # double-buffered x/out + activation
    vmem_limit = min(64 << 20, max(32 << 20, int(1.5 * (weight_bytes + act_bytes))))

    out_padded = pl.pallas_call(
        functools.partial(_fused_mlp_kernel, num_stacked=packed["num_stacked"]),
        out_shape=jax.ShapeDtypeStruct((b_pad, cp), x.dtype),
        grid=grid,
        in_specs=[
            pl.BlockSpec((tm, f), lambda i: (i, 0)),                        # x tile (pipelined)
            pl.BlockSpec((f, hp), lambda i: (0, 0)),                        # w_in  (resident)
            pl.BlockSpec((1, hp), lambda i: (0, 0)),                        # b_in  (resident)
            pl.BlockSpec((n_slab, hid_sub, hid_lane), lambda i: (0, 0, 0)), # w_hid (resident)
            pl.BlockSpec((n_slab, 1, hid_lane), lambda i: (0, 0, 0)),       # b_hid (resident)
            pl.BlockSpec((hp, cp), lambda i: (0, 0)),                       # w_out (resident)
            pl.BlockSpec((1, cp), lambda i: (0, 0)),                        # b_out (resident)
        ],
        out_specs=pl.BlockSpec((tm, cp), lambda i: (i, 0)),
        compiler_params=pltpu.CompilerParams(
            dimension_semantics=("parallel",),
            vmem_limit_bytes=vmem_limit,
        ),
    )(x, packed["w_in"], packed["b_in"], packed["w_hid"], packed["b_hid"],
      packed["w_out"], packed["b_out"])

    return out_padded[:b, :packed["num_classes"]]


def _reference_forward(x, params):
    h = x
    for (w, bb) in params[:-1]:
        h = jnp.maximum(h @ w + bb, 0.0)
    w_last, b_last = params[-1]
    return jax.nn.sigmoid(h @ w_last + b_last)


if __name__ == "__main__":
    # Small shapes consistent with the module's forward (pure MLP on 2-D input).
    batch = 8
    num_features = 32
    num_classes = 4
    num_hidden_layers = 3
    hidden_neurons = 32

    key = jax.random.PRNGKey(0)
    key, kx = jax.random.split(key)
    x = jax.random.normal(kx, (batch, num_features), jnp.float32)

    params = init_params(key, num_features, num_classes,
                         num_hidden_layers, hidden_neurons)
    packed = pack_params(params)

    out = fixed_neurons_network_forward(x, packed)
    out = jax.block_until_ready(out)

    ref = _reference_forward(x, params)
    assert out.shape == (batch, num_classes)
    # Tolerance covers bf16 operands (f32 accumulation) on the MXU; sigmoid is exact (tanh form).
    assert jnp.allclose(out, ref, atol=2e-2, rtol=2e-2), (
        f"max abs err = {jnp.max(jnp.abs(out - ref))}")

    print("KERNEL_OK")
</pallas_src>

<mosaic_0001>
module attributes {stable_mosaic.version = 11 : i64} {
  func.func @_fused_mlp_kernel(%arg0: i32, %arg1: memref<8x32xf32, #tpu.memory_space<vmem>>, %arg2: memref<32x128xbf16, #tpu.memory_space<vmem>>, %arg3: memref<1x128xf32, #tpu.memory_space<vmem>>, %arg4: memref<2x128x128xbf16, #tpu.memory_space<vmem>>, %arg5: memref<2x1x128xf32, #tpu.memory_space<vmem>>, %arg6: memref<128x128xbf16, #tpu.memory_space<vmem>>, %arg7: memref<1x128xf32, #tpu.memory_space<vmem>>, %arg8: memref<8x128xf32, #tpu.memory_space<vmem>>) attributes {dimension_semantics = [#tpu.dimension_semantics<parallel>], iteration_bounds = array<i64: 1>, scalar_prefetch = 0 : i64, scratch_operands = 0 : i64, tpu.core_type = #tpu.core_type<tc>, window_params = [{transform_indices = @transform_0, window_bounds = array<i64: 8, 32>}, {pipeline_mode = #tpu.pipeline_mode<synchronous>, transform_indices = @transform_1, window_bounds = array<i64: 32, 128>}, {pipeline_mode = #tpu.pipeline_mode<synchronous>, transform_indices = @transform_2, window_bounds = array<i64: 1, 128>}, {pipeline_mode = #tpu.pipeline_mode<synchronous>, transform_indices = @transform_3, window_bounds = array<i64: 2, 128, 128>}, {pipeline_mode = #tpu.pipeline_mode<synchronous>, transform_indices = @transform_4, window_bounds = array<i64: 2, 1, 128>}, {pipeline_mode = #tpu.pipeline_mode<synchronous>, transform_indices = @transform_5, window_bounds = array<i64: 128, 128>}, {pipeline_mode = #tpu.pipeline_mode<synchronous>, transform_indices = @transform_6, window_bounds = array<i64: 1, 128>}, {transform_indices = @transform_7, window_bounds = array<i64: 8, 128>}]} {
    %c0 = arith.constant 0 : index
    %c0_0 = arith.constant 0 : index
    %0 = vector.load %arg1[%c0, %c0_0] : memref<8x32xf32, #tpu.memory_space<vmem>>, vector<8x32xf32>
    %1 = arith.truncf %0 : vector<8x32xf32> to vector<8x32xbf16>
    %c0_1 = arith.constant 0 : index
    %c0_2 = arith.constant 0 : index
    %2 = vector.load %arg2[%c0_1, %c0_2] : memref<32x128xbf16, #tpu.memory_space<vmem>>, vector<32x128xbf16>
    %cst = arith.constant dense<0.000000e+00> : vector<8x128xf32>
    %3 = tpu.matmul %1, %2, %cst {dimension_numbers = #tpu.dot_dimension_numbers<[1], [0], [0], [1], [0, 0, 1, 1], [], []>} : vector<8x32xbf16>, vector<32x128xbf16>, vector<8x128xf32> -> vector<8x128xf32>
    %c0_3 = arith.constant 0 : index
    %c0_4 = arith.constant 0 : index
    %4 = vector.load %arg3[%c0_3, %c0_4] : memref<1x128xf32, #tpu.memory_space<vmem>>, vector<1x128xf32>
    %5 = vector.broadcast %4 : vector<1x128xf32> to vector<8x128xf32>
    %6 = arith.addf %3, %5 : vector<8x128xf32>
    %cst_5 = arith.constant 0.000000e+00 : f32
    %7 = vector.broadcast %cst_5 : f32 to vector<8x128xf32>
    %8 = arith.maximumf %6, %7 : vector<8x128xf32>
    %9 = arith.truncf %8 : vector<8x128xf32> to vector<8x128xbf16>
    %c0_6 = arith.constant 0 : index
    %c0_7 = arith.constant 0 : index
    %c0_8 = arith.constant 0 : index
    %10 = vector.load %arg4[%c0_6, %c0_7, %c0_8] : memref<2x128x128xbf16, #tpu.memory_space<vmem>>, vector<1x128x128xbf16>
    %11 = vector.shape_cast %10 : vector<1x128x128xbf16> to vector<128x128xbf16>
    %cst_9 = arith.constant dense<0.000000e+00> : vector<8x128xf32>
    %12 = tpu.matmul %9, %11, %cst_9 {dimension_numbers = #tpu.dot_dimension_numbers<[1], [0], [0], [1], [0, 0, 1, 1], [], []>} : vector<8x128xbf16>, vector<128x128xbf16>, vector<8x128xf32> -> vector<8x128xf32>
    %c0_10 = arith.constant 0 : index
    %c0_11 = arith.constant 0 : index
    %c0_12 = arith.constant 0 : index
    %13 = vector.load %arg5[%c0_10, %c0_11, %c0_12] : memref<2x1x128xf32, #tpu.memory_space<vmem>>, vector<1x1x128xf32>
    %14 = vector.shape_cast %13 : vector<1x1x128xf32> to vector<1x128xf32>
    %15 = vector.broadcast %14 : vector<1x128xf32> to vector<8x128xf32>
    %16 = arith.addf %12, %15 : vector<8x128xf32>
    %cst_13 = arith.constant 0.000000e+00 : f32
    %17 = vector.broadcast %cst_13 : f32 to vector<8x128xf32>
    %18 = arith.maximumf %16, %17 : vector<8x128xf32>
    %19 = arith.truncf %18 : vector<8x128xf32> to vector<8x128xbf16>
    %c1 = arith.constant 1 : index
    %c0_14 = arith.constant 0 : index
    %c0_15 = arith.constant 0 : index
    %20 = vector.load %arg4[%c1, %c0_14, %c0_15] : memref<2x128x128xbf16, #tpu.memory_space<vmem>>, vector<1x128x128xbf16>
    %21 = vector.shape_cast %20 : vector<1x128x128xbf16> to vector<128x128xbf16>
    %cst_16 = arith.constant dense<0.000000e+00> : vector<8x128xf32>
    %22 = tpu.matmul %19, %21, %cst_16 {dimension_numbers = #tpu.dot_dimension_numbers<[1], [0], [0], [1], [0, 0, 1, 1], [], []>} : vector<8x128xbf16>, vector<128x128xbf16>, vector<8x128xf32> -> vector<8x128xf32>
    %c1_17 = arith.constant 1 : index
    %c0_18 = arith.constant 0 : index
    %c0_19 = arith.constant 0 : index
    %23 = vector.load %arg5[%c1_17, %c0_18, %c0_19] : memref<2x1x128xf32, #tpu.memory_space<vmem>>, vector<1x1x128xf32>
    %24 = vector.shape_cast %23 : vector<1x1x128xf32> to vector<1x128xf32>
    %25 = vector.broadcast %24 : vector<1x128xf32> to vector<8x128xf32>
    %26 = arith.addf %22, %25 : vector<8x128xf32>
    %cst_20 = arith.constant 0.000000e+00 : f32
    %27 = vector.broadcast %cst_20 : f32 to vector<8x128xf32>
    %28 = arith.maximumf %26, %27 : vector<8x128xf32>
    %29 = arith.truncf %28 : vector<8x128xf32> to vector<8x128xbf16>
    %c0_21 = arith.constant 0 : index
    %c0_22 = arith.constant 0 : index
    %30 = vector.load %arg6[%c0_21, %c0_22] : memref<128x128xbf16, #tpu.memory_space<vmem>>, vector<128x128xbf16>
    %cst_23 = arith.constant dense<0.000000e+00> : vector<8x128xf32>
    %31 = tpu.matmul %29, %30, %cst_23 {dimension_numbers = #tpu.dot_dimension_numbers<[1], [0], [0], [1], [0, 0, 1, 1], [], []>} : vector<8x128xbf16>, vector<128x128xbf16>, vector<8x128xf32> -> vector<8x128xf32>
    %c0_24 = arith.constant 0 : index
    %c0_25 = arith.constant 0 : index
    %32 = vector.load %arg7[%c0_24, %c0_25] : memref<1x128xf32, #tpu.memory_space<vmem>>, vector<1x128xf32>
    %33 = vector.broadcast %32 : vector<1x128xf32> to vector<8x128xf32>
    %34 = arith.addf %31, %33 : vector<8x128xf32>
    %cst_26 = arith.constant 5.000000e-01 : f32
    %35 = vector.broadcast %cst_26 : f32 to vector<8x128xf32>
    %36 = arith.mulf %35, %34 : vector<8x128xf32>
    %37 = math.tanh %36 : vector<8x128xf32>
    %cst_27 = arith.constant 1.000000e+00 : f32
    %38 = vector.broadcast %cst_27 : f32 to vector<8x128xf32>
    %39 = arith.addf %37, %38 : vector<8x128xf32>
    %cst_28 = arith.constant 5.000000e-01 : f32
    %40 = vector.broadcast %cst_28 : f32 to vector<8x128xf32>
    %41 = arith.mulf %40, %39 : vector<8x128xf32>
    %c0_29 = arith.constant 0 : index
    %c0_30 = arith.constant 0 : index
    %42 = vector.load %arg8[%c0_29, %c0_30] : memref<8x128xf32, #tpu.memory_space<vmem>>, vector<8x128xf32>
    tpu.vector_store %arg8[%c0_29, %c0_30], %41 {strides = array<i32>} : memref<8x128xf32, #tpu.memory_space<vmem>>, vector<8x128xf32>,
    return
  }
  func.func @transform_0(%arg0: i32) -> (i32, i32) {
    %c0_i32 = arith.constant 0 : i32
    %c0_i32_0 = arith.constant 0 : i32
    return %arg0, %c0_i32 : i32, i32
  }
  func.func @transform_1(%arg0: i32) -> (i32, i32) {
    %c0_i32 = arith.constant 0 : i32
    %c0_i32_0 = arith.constant 0 : i32
    %c0_i32_1 = arith.constant 0 : i32
    return %c0_i32, %c0_i32_0 : i32, i32
  }
  func.func @transform_2(%arg0: i32) -> (i32, i32) {
    %c0_i32 = arith.constant 0 : i32
    %c0_i32_0 = arith.constant 0 : i32
    %c0_i32_1 = arith.constant 0 : i32
    return %c0_i32, %c0_i32_0 : i32, i32
  }
  func.func @transform_3(%arg0: i32) -> (i32, i32, i32) {
    %c0_i32 = arith.constant 0 : i32
    %c0_i32_0 = arith.constant 0 : i32
    %c0_i32_1 = arith.constant 0 : i32
    %c0_i32_2 = arith.constant 0 : i32
    return %c0_i32, %c0_i32_0, %c0_i32_1 : i32, i32, i32
  }
  func.func @transform_4(%arg0: i32) -> (i32, i32, i32) {
    %c0_i32 = arith.constant 0 : i32
    %c0_i32_0 = arith.constant 0 : i32
    %c0_i32_1 = arith.constant 0 : i32
    %c0_i32_2 = arith.constant 0 : i32
    return %c0_i32, %c0_i32_0, %c0_i32_1 : i32, i32, i32
  }
  func.func @transform_5(%arg0: i32) -> (i32, i32) {
    %c0_i32 = arith.constant 0 : i32
    %c0_i32_0 = arith.constant 0 : i32
    %c0_i32_1 = arith.constant 0 : i32
    return %c0_i32, %c0_i32_0 : i32, i32
  }
  func.func @transform_6(%arg0: i32) -> (i32, i32) {
    %c0_i32 = arith.constant 0 : i32
    %c0_i32_0 = arith.constant 0 : i32
    %c0_i32_1 = arith.constant 0 : i32
    return %c0_i32, %c0_i32_0 : i32, i32
  }
  func.func @transform_7(%arg0: i32) -> (i32, i32) {
    %c0_i32 = arith.constant 0 : i32
    %c0_i32_0 = arith.constant 0 : i32
    return %arg0, %c0_i32 : i32, i32
  }
}

</mosaic_0001>

<bundles_post_ra>
// kernel: tpu_custom_call.1
= control target key start
LH: loop header
LB: loop body
LE: loop exit
PB: predicated region body
PF: predicated region fallthrough
CT: control target
= control target key end

     0   :  { %12 = vsyncpa [#allocation3], 0  ;;  %s750_s0 = inlined_call_operand.hbm [shape: f32[8,32], index: 0, kind: input, shape index: {}]   ;;  %s751_s1 = inlined_call_operand.hbm [shape: bf16[32,128], index: 1, kind: input, shape index: {}]   ;;  %s752_s2 = inlined_call_operand.vmem [shape: f32[1,128], index: 2, kind: input, shape index: {}]   ;;  %s753_s3 = inlined_call_operand.hbm [shape: bf16[2,128,128], index: 3, kind: input, shape index: {}]   ;;  %s754_s4 = inlined_call_operand.vmem [shape: f32[2,1,128], index: 4, kind: input, shape index: {}]   ;;  %s755_s5 = inlined_call_operand.hbm [shape: bf16[128,128], index: 5, kind: input, shape index: {}]   ;;  %s756_s6 = inlined_call_operand.vmem [shape: f32[1,128], index: 6, kind: input, shape index: {}]   ;;  %s757_s7 = inlined_call_operand.hbm [shape: f32[8,128], index: 7, kind: output, shape index: {}]  }
   0x1   :  { %13 = vsyncpa [#allocation6], 0 }
   0x2   :  { %14 = vsyncpa [#allocation9], 0  ;;  %s31_s26 = sshll.u32 %s751_s1, 4  ;;  %s32_s26 = int_to_ptr.hbm [resolvable:$true] %s31_s26 }
   0x3   :  { %15 = vsyncpa [#allocation4], 0  ;;  %s676_s27 = smov [#allocation5]   ;;  %s21_s8 = sshll.u32 %s750_s0, 4  ;;  %s22_s8 = int_to_ptr.hbm [resolvable:$true] %s21_s8 }
   0x4   :  { %s33_s28 = sshll.u32 %s676_s27, 4  ;;  %s677_s9 = smov 64   ;;  %s34_s28 = int_to_ptr.vmem [resolvable:$true] %s33_s28 }
   0x5   :  { %s678_s10 = smov 4   ;;  %s679_s11 = smov [#allocation2]  }
   0x6   :  { %39 = dma.hbm_to_vmem [thread:$0]  %s32_s26, 256, %s34_s28, [#allocation6], %s677_s9, %s677_s9, %s678_s10  }
   0x7   :  { %s23_s12 = sshll.u32 %s679_s11, 4  ;;  %s46_s15 = sshll.u32 %s753_s3, 4  ;;  %s24_s12 = int_to_ptr.vmem [resolvable:$true] %s23_s12  ;;  %s47_s15 = int_to_ptr.hbm [resolvable:$true] %s46_s15 }
   0x8   :  { %26 = dma.hbm_to_vmem [thread:$0]  %s22_s8, 128, %s24_s12, [#allocation3]  }
   0x9   :  { %s61_s17 = sshll.u32 %s755_s5, 4  ;;  %s680_s18 = smov [#allocation7]   ;;  %s62_s17 = int_to_ptr.hbm [resolvable:$true] %s61_s17 }
   0xa   :  { %s48_s19 = sshll.u32 %s680_s18, 4  ;;  %s681_s0 = smov [#allocation8]   ;;  %s49_s19 = int_to_ptr.vmem [resolvable:$true] %s48_s19 }
   0xb   :  { %54 = dma.hbm_to_vmem [thread:$0]  %s47_s15, 2048, %s49_s19, [#allocation6], %s677_s9, %s677_s9, %s678_s10  }
   0xc   :  { %s63_s20 = sshll.u32 %s681_s0, 4  ;;  %s64_s20 = int_to_ptr.vmem [resolvable:$true] %s63_s20 }
   0xd   :  { %69 = dma.hbm_to_vmem [thread:$0]  %s62_s17, 1024, %s64_s20, [#allocation9], %s677_s9, %s677_s9, %s678_s10  }
   0xe   :  { %668 = dma.done.wait [#allocation3], 128  }
   0xf   :  { %669 = vsyncadd [#allocation3], 4294967168 }
  0x10   :  { %670 = dma.done.wait [#allocation6], 2304  }
  0x11   :  { %671 = vsyncadd [#allocation6], 4294964992 }
  0x12   :  { %672 = dma.done.wait [#allocation9], 1024  }
  0x13   :  { %673 = vsyncadd [#allocation9], 4294966272  ;;  %v510_v0 = vld [vmem:[#allocation5 + $0x8] sm:$0xff]  ;;  %v509_v2 = vld [vmem:[#allocation5] sm:$0xff]  ;;  %vm111_vm0 = vcmask 261120   ;;  %s682_s26 = smov [#allocation10]  }
  0x14   :  { %v518_v1 = vld [vmem:[#allocation7 + $0x38] sm:$0xff]  ;;  %121 = vmatpush.bf16.msra.mxu0 %v510_v0  ;;  %v89_v3 = vld [vmem:[#allocation2] sm:$0xff]  ;;  %v517_v4 = vld [vmem:[#allocation7 + $0x30] sm:$0xff]  ;;  %s389_s27 = sshll.u32 %s682_s26, 4  ;;  %s391_s29 = sshll.u32 %s757_s7, 4  ;;  %s390_s27 = int_to_ptr.vmem [resolvable:$true] %s389_s27  ;;  %s392_s29 = int_to_ptr.hbm [resolvable:$true] %s391_s29 }
  0x15   :  { %198 = vmatpush.bf16.msra.mxu1 %v518_v1  ;;  %v90_v5 = vpack.c.bf16 %v89_v3, %v89_v3  ;;  %v516_v6 = vld [vmem:[#allocation7 + $0x28] sm:$0xff]  ;;  %v515_v7 = vld [vmem:[#allocation7 + $0x20] sm:$0xff]  ;;  %v514_v8 = vld [vmem:[#allocation7 + $0x18] sm:$0xff] }
  0x16   :  { %v513_v9 = vld [vmem:[#allocation7 + $0x10] sm:$0xff]  ;;  %v512_v10 = vld [vmem:[#allocation7 + $0x8] sm:$0xff]  ;;  %v511_v11 = vld [vmem:[#allocation7] sm:$0xff] }
  0x17   :  { %v526_v12 = vld [vmem:[#allocation7 + $0x78] sm:$0xff]  ;;  %v525_v13 = vld [vmem:[#allocation7 + $0x70] sm:$0xff]  ;;  %v524_v14 = vld [vmem:[#allocation7 + $0x68] sm:$0xff] }
  0x18   :  { %122 = vmatpush.bf16.msra.mxu0 %v509_v2  ;;  %283 = vmatpush.bf16.msra.mxu2 %v526_v12  ;;  %v523_v15 = vld [vmem:[#allocation7 + $0x60] sm:$0xff]  ;;  %v522_v16 = vld [vmem:[#allocation7 + $0x58] sm:$0xff]  ;;  %v521_v17 = vld [vmem:[#allocation7 + $0x50] sm:$0xff] }
  0x19   :  { %199 = vmatpush.bf16.msra.mxu1 %v517_v4  ;;  %v542_v18 = vld [vmem:[%s752_s2] ss:$0 sm:$0xff]  ;;  %v519_v25 = vld [vmem:[#allocation7 + $0x40] sm:$0xff]  ;;  %v534_v26 = vld [vmem:[#allocation8 + $0x38] sm:$0xff] }
  0x1a   :  { %v520_v24 = vld [vmem:[#allocation7 + $0x48] sm:$0xff]  ;;  %366 = vmatpush.bf16.msra.mxu3 %v534_v26  ;;  %v533_v27 = vld [vmem:[#allocation8 + $0x30] sm:$0xff]  ;;  %v531_v29 = vld [vmem:[#allocation8 + $0x20] sm:$0xff] }
  0x1b   :  { %411 = vmatmul.msk.bf16.vlgmr.msra.gmra.mxu0 %vm111_vm0, %v90_v5  ;;  %v532_v28 = vld [vmem:[#allocation8 + $0x28] sm:$0xff]  ;;  %v530_v30 = vld [vmem:[#allocation8 + $0x18] sm:$0xff]  ;;  %v529_v31 = vld [vmem:[#allocation8 + $0x10] sm:$0xff] }
  0x1c   :  { %284 = vmatpush.bf16.msra.mxu2 %v525_v13  ;;  %v543_v32 = vld [vmem:[%s754_s4] ss:$0 sm:$0xff]  ;;  %v527_v39 = vld [vmem:[#allocation8] sm:$0xff]  ;;  %v544_v40 = vld [vmem:[%s754_s4 + $0x1] ss:$0 sm:$0xff] }
  0x1d   :  { %200 = vmatpush.bf16.msra.mxu1 %v516_v6  ;;  %v528_v38 = vld [vmem:[#allocation8 + $0x8] sm:$0xff] }
  0x1e   :  { %367 = vmatpush.bf16.msra.mxu3 %v533_v27  ;;  %v545_v46 = vld [vmem:[%s756_s6] ss:$0 sm:$0xff] }
  0x20   :  { %285 = vmatpush.bf16.msra.mxu2 %v524_v14 }
  0x21   :  { %201 = vmatpush.bf16.msra.mxu1 %v515_v7 }
  0x22   :  { %368 = vmatpush.bf16.msra.mxu3 %v532_v28 }
  0x24   :  { %286 = vmatpush.bf16.msra.mxu2 %v523_v15 }
  0x25   :  { %202 = vmatpush.bf16.msra.mxu1 %v514_v8 }
  0x26   :  { %369 = vmatpush.bf16.msra.mxu3 %v531_v29 }
  0x28   :  { %287 = vmatpush.bf16.msra.mxu2 %v522_v16 }
  0x29   :  { %203 = vmatpush.bf16.msra.mxu1 %v513_v9 }
  0x2a   :  { %370 = vmatpush.bf16.msra.mxu3 %v530_v30 }
  0x2c   :  { %288 = vmatpush.bf16.msra.mxu2 %v521_v17 }
  0x2d   :  { %204 = vmatpush.bf16.msra.mxu1 %v512_v10 }
  0x2e   :  { %371 = vmatpush.bf16.msra.mxu3 %v529_v31 }
  0x30   :  { %289 = vmatpush.bf16.msra.mxu2 %v520_v24 }
  0x31   :  { %205 = vmatpush.bf16.msra.mxu1 %v511_v11 }
  0x32   :  { %372 = vmatpush.bf16.msra.mxu3 %v528_v38 }
  0x34   :  { %290 = vmatpush.bf16.msra.mxu2 %v519_v25 }
  0x36   :  { %373 = vmatpush.bf16.msra.mxu3 %v527_v39 }
  0x98   :  { %v124_v19 = vpop.f32.mrf.mxu0 }
  0x99   :  { %v125_v20 = vadd.f32 %v542_v18, %v124_v19 }
  0x9b   :  { %v128_v21 = vmax.f32 %v125_v20, 0.0 }
  0x9d   :  { %v129_v22 = vpack.c.bf16 %v128_v21, %v128_v21 }
  0x9f   :  { %206 = vmatmul.bf16.vlgmr.msra.gmra.mxu1 %v129_v22 }
  0xa0   :  { %v126_v23 = vpop.f32.mrf.mxu0 }
 0x11c   :  { %v207_v33 = vpop.f32.mrf.mxu1 }
 0x11d   :  { %v208_v34 = vadd.f32 %v543_v32, %v207_v33 }
 0x11f   :  { %v211_v35 = vmax.f32 %v208_v34, 0.0 }
 0x121   :  { %v212_v36 = vpack.c.bf16 %v211_v35, %v211_v35 }
 0x123   :  { %291 = vmatmul.bf16.vlgmr.msra.gmra.mxu2 %v212_v36 }
 0x124   :  { %v209_v37 = vpop.f32.mrf.mxu1 }
 0x1a6   :  { %v292_v41 = vpop.f32.mrf.mxu2 }
 0x1a7   :  { %v293_v42 = vadd.f32 %v544_v40, %v292_v41 }
 0x1a9   :  { %v296_v43 = vmax.f32 %v293_v42, 0.0 }
 0x1ab   :  { %v297_v44 = vpack.c.bf16 %v296_v43, %v296_v43 }
 0x1ad   :  { %374 = vmatmul.bf16.vlgmr.msra.gmra.mxu3 %v297_v44 }
 0x1ae   :  { %v294_v45 = vpop.f32.mrf.mxu2 }
 0x230   :  { %v375_v47 = vpop.f32.mrf.mxu3 }
 0x231   :  { %v376_v48 = vadd.f32 %v545_v46, %v375_v47 }
 0x233   :  { %v379_v49 = vmul.f32 0.5, %v376_v48 }
 0x235   :  { %546 = vtanh.f32 %v379_v49 }
 0x238   :  { %v377_v50 = vpop.f32.mrf.mxu3 }
 0x23b   :  { %v547_v51 = vpop.eup %546 }
 0x23c   :  { %v381_v52 = vadd.f32 1.0, %v547_v51 }
 0x23e   :  { %v382_v53 = vmul.f32 0.5, %v381_v52 }
 0x240   :  { %383 = vst [vmem:[#allocation10] sm:$0xff] %v382_v53 }
 0x241   :  { %394 = dma.vmem_to_hbm [thread:$0]  %s390_s27, 128, %s392_s29, [#allocation4]  }
 0x242   :  { %674 = dma.done.wait [#allocation4], 128  }
 0x243   :  { %675 = vsyncadd [#allocation4], 4294967168 }
 0x244   :  { %399 = vsyncpa [#allocation3], 1 }
 0x245   :  { %400 = vsyncpa [#allocation6], 1 }
 0x246   :  { %401 = vsyncpa [#allocation9], 1 }
 0x247   :  { %402 = vsyncpa [#allocation4], 1 }

</bundles_post_ra>
